<compile_context>
chip_gen: v7x
topology: tpu7x:2x2x1
jax: 0.10.0
libtpu: 0.0.40
codegen_flags: <defaults>
</compile_context>

<pallas_src>
import numpy as np
import jax
import jax.numpy as jnp
from jax import lax
from jax.experimental import pallas as pl
from jax.experimental.pallas import tpu as pltpu  # noqa: F401  (TPU backend assumed)

INPUT_DIM = 128
HIDDEN_DIM = 32
HIDDEN_DIM2 = 16   # declared in Discriminator.__init__ but unused by its forward
EPS = 1e-5         # PyTorch BatchNorm1d default eps

# Rows of the packed (8, HIDDEN_DIM) parameter slab.
_ROW_B1, _ROW_G1, _ROW_BE1, _ROW_W2, _ROW_B2, _ROW_G2, _ROW_BE2 = range(7)


def _adv_kernel(src_ref, tgt_ref, w1_ref, slab_ref, loss_ref):
    """Single invocation: both domains through one MXU matmul, per-domain BN/BCE."""
    ns = src_ref.shape[0]
    nt = tgt_ref.shape[0]

    # Packed small parameters (single VMEM slab).
    b1  = slab_ref[_ROW_B1:_ROW_B1 + 1, :]                              # (1, 32)
    g1  = slab_ref[_ROW_G1:_ROW_G1 + 1, :]
    be1 = slab_ref[_ROW_BE1:_ROW_BE1 + 1, :]
    w2  = slab_ref[_ROW_W2:_ROW_W2 + 1, :]                              # (1, 32)
    b2  = slab_ref[_ROW_B2:_ROW_B2 + 1, 0:1]                            # (1, 1)
    g2  = slab_ref[_ROW_G2:_ROW_G2 + 1, 0:1]
    be2 = slab_ref[_ROW_BE2:_ROW_BE2 + 1, 0:1]

    # Stack the two domains along the row axis inside VMEM (cheap sublane concat),
    # so the first Linear is a single (Ns+Nt,128)@(128,32) MXU call.
    x = jnp.concatenate(
        [src_ref[...].astype(jnp.float32), tgt_ref[...].astype(jnp.float32)], axis=0)

    h = jnp.dot(x, w1_ref[...], preferred_element_type=jnp.float32) + b1    # (Ns+Nt, 32)

    def domain_loss(hd, negate_logit):
        # ---- BatchNorm1d(hidden_dim), training mode (biased var, one-pass) ----
        mu1 = jnp.mean(hd, axis=0, keepdims=True)
        var1 = jnp.mean(hd * hd, axis=0, keepdims=True) - mu1 * mu1
        hd = (hd - mu1) * (lax.rsqrt(var1 + EPS) * g1) + be1
        # ---- ReLU ----
        hd = jnp.maximum(hd, 0.0)
        # ---- Linear(hidden_dim, 1): VPU multiply + lane reduction ----
        z = jnp.sum(hd * w2, axis=-1, keepdims=True) + b2                   # (N, 1)
        # ---- BatchNorm1d(1), training mode ----
        mu2 = jnp.mean(z, axis=0, keepdims=True)
        var2 = jnp.mean(z * z, axis=0, keepdims=True) - mu2 * mu2
        z = (z - mu2) * (lax.rsqrt(var2 + EPS) * g2) + be2
        # ---- Sigmoid + BCELoss fused in logits space ----
        # label = 1 (source):  -log sigmoid(z)      = softplus(-z)
        # label = 0 (target):  -log(1 - sigmoid(z)) = softplus(+z)
        # PyTorch clamps log at -100 => clamp the per-sample loss at 100.
        z_eff = -z if negate_logit else z          # trace-time constant; no runtime select
        sp = jnp.maximum(z_eff, 0.0) + jnp.log(1.0 + jnp.exp(-jnp.abs(z_eff)))
        bce = jnp.minimum(sp, 100.0)                                         # (N, 1)
        return jnp.mean(bce, axis=0, keepdims=True)                          # (1, 1)

    loss_s = domain_loss(h[0:ns, :], True)           # source, label 1
    loss_t = domain_loss(h[ns:ns + nt, :], False)    # target, label 0

    loss_ref[...] = loss_s + loss_t                  # (1, 1) scalar-sized output


def pack_param_slab(params):
    """Pack the seven tiny parameter tensors into one (8, HIDDEN_DIM) f32 slab."""
    def row(v):
        v = v.reshape(1, -1).astype(jnp.float32)
        return jnp.pad(v, ((0, 0), (0, HIDDEN_DIM - v.shape[1])))
    rows = [
        row(params["b1"]), row(params["g1"]), row(params["be1"]),
        row(params["w2"].reshape(1, HIDDEN_DIM)),      # (32,1) column -> row
        row(params["b2"]), row(params["g2"]), row(params["be2"]),
        jnp.zeros((1, HIDDEN_DIM), jnp.float32),
    ]
    return jnp.concatenate(rows, axis=0)               # (8, 32)


def lambda_scheduler_lamb(curr_iter, gamma=1.0, max_iter=1000):
    # LambdaSheduler.lamb(): Python-side scalar schedule. ReverseLayerF is identity in the
    # forward pass, so lamb only scales gradients and has no effect on the forward value.
    p = curr_iter / max_iter
    return 2.0 / (1.0 + np.exp(-gamma * p)) - 1.0


def adversarial_loss(source, target, params, curr_iter=0):
    """source_loss + target_loss via ONE fused, single-step pallas_call."""
    _lamb = lambda_scheduler_lamb(curr_iter)   # computed for parity; unused in forward math
    ns, nt = source.shape[0], target.shape[0]
    slab = pack_param_slab(params)             # (8, 32)

    out = pl.pallas_call(
        _adv_kernel,
        out_shape=jax.ShapeDtypeStruct((1, 1), jnp.float32),
        in_specs=[
            pl.BlockSpec((ns, INPUT_DIM), lambda: (0, 0)),           # source (full block)
            pl.BlockSpec((nt, INPUT_DIM), lambda: (0, 0)),           # target (full block)
            pl.BlockSpec((INPUT_DIM, HIDDEN_DIM), lambda: (0, 0)),   # w1
            pl.BlockSpec((8, HIDDEN_DIM), lambda: (0, 0)),           # packed param slab
        ],
        out_specs=pl.BlockSpec((1, 1), lambda: (0, 0)),
    )(source, target, params["w1"], slab)

    return out[0, 0]


def init_params(key):
    """Deterministic synthetic init (PyTorch Linear-style uniform; BN weight=1, bias=0)."""
    k1, k2, k3, k4 = jax.random.split(key, 4)
    bound1 = 1.0 / np.sqrt(INPUT_DIM)
    bound2 = 1.0 / np.sqrt(HIDDEN_DIM)
    return dict(
        w1=jax.random.uniform(k1, (INPUT_DIM, HIDDEN_DIM), jnp.float32, -bound1, bound1),
        b1=jax.random.uniform(k2, (1, HIDDEN_DIM), jnp.float32, -bound1, bound1),
        g1=jnp.ones((1, HIDDEN_DIM), jnp.float32),
        be1=jnp.zeros((1, HIDDEN_DIM), jnp.float32),
        w2=jax.random.uniform(k3, (HIDDEN_DIM, 1), jnp.float32, -bound2, bound2),
        b2=jax.random.uniform(k4, (1, 1), jnp.float32, -bound2, bound2),
        g2=jnp.ones((1, 1), jnp.float32),
        be2=jnp.zeros((1, 1), jnp.float32),
    )


def _ref_domain_loss(x, y, p):
    """Pure-JAX reference of Discriminator + BCE (training-mode BN, sigmoid + BCELoss)."""
    h = x @ p["w1"] + p["b1"]
    mu = h.mean(0, keepdims=True)
    var = ((h - mu) ** 2).mean(0, keepdims=True)
    h = (h - mu) / jnp.sqrt(var + EPS) * p["g1"] + p["be1"]
    h = jnp.maximum(h, 0.0)
    z = h @ p["w2"] + p["b2"]
    mu2 = z.mean(0, keepdims=True)
    var2 = ((z - mu2) ** 2).mean(0, keepdims=True)
    z = (z - mu2) / jnp.sqrt(var2 + EPS) * p["g2"] + p["be2"]
    pr = jax.nn.sigmoid(z)
    return jnp.mean(-(y * jnp.log(pr) + (1.0 - y) * jnp.log(1.0 - pr)))


if __name__ == "__main__":
    key = jax.random.PRNGKey(0)
    kp, ks, kt = jax.random.split(key, 3)
    params = init_params(kp)

    N = 8  # small batch; feature dim fixed at 128 by Discriminator(input_dim=128)
    source = jax.random.normal(ks, (N, INPUT_DIM), dtype=jnp.float32)
    target = jax.random.normal(kt, (N, INPUT_DIM), dtype=jnp.float32) + 0.5

    loss = adversarial_loss(source, target, params, curr_iter=0)
    loss = jax.block_until_ready(loss)

    ref = _ref_domain_loss(source, 1.0, params) + _ref_domain_loss(target, 0.0, params)
    np.testing.assert_allclose(np.asarray(loss), np.asarray(ref), rtol=1e-4, atol=1e-5)

    print("KERNEL_OK")
</pallas_src>

<mosaic_0001>
module attributes {stable_mosaic.version = 11 : i64} {
  func.func @_adv_kernel(%arg0: memref<8x128xf32, #tpu.memory_space<vmem>>, %arg1: memref<8x128xf32, #tpu.memory_space<vmem>>, %arg2: memref<128x32xf32, #tpu.memory_space<vmem>>, %arg3: memref<8x32xf32, #tpu.memory_space<vmem>>, %arg4: memref<1x1xf32, #tpu.memory_space<vmem>>) attributes {dimension_semantics = [], scalar_prefetch = 0 : i64, scratch_operands = 0 : i64, tpu.core_type = #tpu.core_type<tc>} {
    %c0 = arith.constant 0 : index
    %c0_0 = arith.constant 0 : index
    %0 = vector.load %arg3[%c0, %c0_0] : memref<8x32xf32, #tpu.memory_space<vmem>>, vector<1x32xf32>
    %c1 = arith.constant 1 : index
    %c0_1 = arith.constant 0 : index
    %1 = vector.load %arg3[%c1, %c0_1] : memref<8x32xf32, #tpu.memory_space<vmem>>, vector<1x32xf32>
    %c2 = arith.constant 2 : index
    %c0_2 = arith.constant 0 : index
    %2 = vector.load %arg3[%c2, %c0_2] : memref<8x32xf32, #tpu.memory_space<vmem>>, vector<1x32xf32>
    %c3 = arith.constant 3 : index
    %c0_3 = arith.constant 0 : index
    %3 = vector.load %arg3[%c3, %c0_3] : memref<8x32xf32, #tpu.memory_space<vmem>>, vector<1x32xf32>
    %c4 = arith.constant 4 : index
    %c0_4 = arith.constant 0 : index
    %4 = vector.load %arg3[%c4, %c0_4] : memref<8x32xf32, #tpu.memory_space<vmem>>, vector<1x1xf32>
    %c5 = arith.constant 5 : index
    %c0_5 = arith.constant 0 : index
    %5 = vector.load %arg3[%c5, %c0_5] : memref<8x32xf32, #tpu.memory_space<vmem>>, vector<1x1xf32>
    %c6 = arith.constant 6 : index
    %c0_6 = arith.constant 0 : index
    %6 = vector.load %arg3[%c6, %c0_6] : memref<8x32xf32, #tpu.memory_space<vmem>>, vector<1x1xf32>
    %c0_7 = arith.constant 0 : index
    %c0_8 = arith.constant 0 : index
    %7 = vector.load %arg0[%c0_7, %c0_8] : memref<8x128xf32, #tpu.memory_space<vmem>>, vector<8x128xf32>
    %c0_9 = arith.constant 0 : index
    %c0_10 = arith.constant 0 : index
    %8 = vector.load %arg1[%c0_9, %c0_10] : memref<8x128xf32, #tpu.memory_space<vmem>>, vector<8x128xf32>
    %9 = tpu.concatenate %7, %8 in 0 : vector<8x128xf32>, vector<8x128xf32> -> vector<16x128xf32>
    %c0_11 = arith.constant 0 : index
    %c0_12 = arith.constant 0 : index
    %10 = vector.load %arg2[%c0_11, %c0_12] : memref<128x32xf32, #tpu.memory_space<vmem>>, vector<128x32xf32>
    %cst = arith.constant dense<0.000000e+00> : vector<16x32xf32>
    %11 = tpu.matmul %9, %10, %cst {dimension_numbers = #tpu.dot_dimension_numbers<[1], [0], [0], [1], [0, 0, 1, 1], [], []>} : vector<16x128xf32>, vector<128x32xf32>, vector<16x32xf32> -> vector<16x32xf32>
    %12 = vector.broadcast %0 : vector<1x32xf32> to vector<16x32xf32>
    %13 = arith.addf %11, %12 : vector<16x32xf32>
    %14 = vector.extract_strided_slice %13 {offsets = [0, 0], sizes = [8, 32], strides = [1, 1]} : vector<16x32xf32> to vector<8x32xf32>
    %cst_13 = arith.constant dense<0.000000e+00> : vector<32xf32>
    %15 = vector.multi_reduction <add>, %14, %cst_13 [0] : vector<8x32xf32> to vector<32xf32>
    %16 = vector.shape_cast %15 : vector<32xf32> to vector<1x32xf32>
    %cst_14 = arith.constant 8.000000e+00 : f32
    %17 = vector.broadcast %cst_14 : f32 to vector<1x32xf32>
    %18 = arith.divf %16, %17 : vector<1x32xf32>
    %19 = arith.mulf %14, %14 : vector<8x32xf32>
    %cst_15 = arith.constant dense<0.000000e+00> : vector<32xf32>
    %20 = vector.multi_reduction <add>, %19, %cst_15 [0] : vector<8x32xf32> to vector<32xf32>
    %21 = vector.shape_cast %20 : vector<32xf32> to vector<1x32xf32>
    %cst_16 = arith.constant 8.000000e+00 : f32
    %22 = vector.broadcast %cst_16 : f32 to vector<1x32xf32>
    %23 = arith.divf %21, %22 : vector<1x32xf32>
    %24 = arith.mulf %18, %18 : vector<1x32xf32>
    %25 = arith.subf %23, %24 : vector<1x32xf32>
    %26 = vector.broadcast %18 : vector<1x32xf32> to vector<8x32xf32>
    %27 = arith.subf %14, %26 : vector<8x32xf32>
    %cst_17 = arith.constant 9.99999974E-6 : f32
    %28 = vector.broadcast %cst_17 : f32 to vector<1x32xf32>
    %29 = arith.addf %25, %28 : vector<1x32xf32>
    %30 = math.rsqrt %29 : vector<1x32xf32>
    %31 = arith.mulf %30, %1 : vector<1x32xf32>
    %32 = vector.broadcast %31 : vector<1x32xf32> to vector<8x32xf32>
    %33 = arith.mulf %27, %32 : vector<8x32xf32>
    %34 = vector.broadcast %2 : vector<1x32xf32> to vector<8x32xf32>
    %35 = arith.addf %33, %34 : vector<8x32xf32>
    %cst_18 = arith.constant 0.000000e+00 : f32
    %36 = vector.broadcast %cst_18 : f32 to vector<8x32xf32>
    %37 = arith.maximumf %35, %36 : vector<8x32xf32>
    %38 = vector.broadcast %3 : vector<1x32xf32> to vector<8x32xf32>
    %39 = arith.mulf %37, %38 : vector<8x32xf32>
    %cst_19 = arith.constant dense<0.000000e+00> : vector<8xf32>
    %40 = vector.multi_reduction <add>, %39, %cst_19 [1] : vector<8x32xf32> to vector<8xf32>
    %41 = vector.shape_cast %40 : vector<8xf32> to vector<8x1xf32>
    %42 = vector.broadcast %4 : vector<1x1xf32> to vector<8x1xf32>
    %43 = arith.addf %41, %42 : vector<8x1xf32>
    %cst_20 = arith.constant dense<0.000000e+00> : vector<1xf32>
    %44 = vector.multi_reduction <add>, %43, %cst_20 [0] : vector<8x1xf32> to vector<1xf32>
    %45 = vector.shape_cast %44 : vector<1xf32> to vector<1x1xf32>
    %cst_21 = arith.constant 8.000000e+00 : f32
    %46 = vector.broadcast %cst_21 : f32 to vector<1x1xf32>
    %47 = arith.divf %45, %46 : vector<1x1xf32>
    %48 = arith.mulf %43, %43 : vector<8x1xf32>
    %cst_22 = arith.constant dense<0.000000e+00> : vector<1xf32>
    %49 = vector.multi_reduction <add>, %48, %cst_22 [0] : vector<8x1xf32> to vector<1xf32>
    %50 = vector.shape_cast %49 : vector<1xf32> to vector<1x1xf32>
    %cst_23 = arith.constant 8.000000e+00 : f32
    %51 = vector.broadcast %cst_23 : f32 to vector<1x1xf32>
    %52 = arith.divf %50, %51 : vector<1x1xf32>
    %53 = arith.mulf %47, %47 : vector<1x1xf32>
    %54 = arith.subf %52, %53 : vector<1x1xf32>
    %55 = vector.broadcast %47 : vector<1x1xf32> to vector<8x1xf32>
    %56 = arith.subf %43, %55 : vector<8x1xf32>
    %cst_24 = arith.constant 9.99999974E-6 : f32
    %57 = vector.broadcast %cst_24 : f32 to vector<1x1xf32>
    %58 = arith.addf %54, %57 : vector<1x1xf32>
    %59 = math.rsqrt %58 : vector<1x1xf32>
    %60 = arith.mulf %59, %5 : vector<1x1xf32>
    %61 = vector.broadcast %60 : vector<1x1xf32> to vector<8x1xf32>
    %62 = arith.mulf %56, %61 : vector<8x1xf32>
    %63 = vector.broadcast %6 : vector<1x1xf32> to vector<8x1xf32>
    %64 = arith.addf %62, %63 : vector<8x1xf32>
    %cst_25 = arith.constant 0.000000e+00 : f32
    %65 = vector.broadcast %cst_25 : f32 to vector<8x1xf32>
    %66 = arith.subf %65, %64 : vector<8x1xf32>
    %cst_26 = arith.constant 0.000000e+00 : f32
    %67 = vector.broadcast %cst_26 : f32 to vector<8x1xf32>
    %68 = arith.maximumf %66, %67 : vector<8x1xf32>
    %69 = math.absf %66 : vector<8x1xf32>
    %cst_27 = arith.constant 0.000000e+00 : f32
    %70 = vector.broadcast %cst_27 : f32 to vector<8x1xf32>
    %71 = arith.subf %70, %69 : vector<8x1xf32>
    %72 = math.exp %71 : vector<8x1xf32>
    %cst_28 = arith.constant 1.000000e+00 : f32
    %73 = vector.broadcast %cst_28 : f32 to vector<8x1xf32>
    %74 = arith.addf %73, %72 : vector<8x1xf32>
    %75 = math.log %74 : vector<8x1xf32>
    %76 = arith.addf %68, %75 : vector<8x1xf32>
    %cst_29 = arith.constant 1.000000e+02 : f32
    %77 = vector.broadcast %cst_29 : f32 to vector<8x1xf32>
    %78 = arith.minimumf %76, %77 : vector<8x1xf32>
    %cst_30 = arith.constant dense<0.000000e+00> : vector<1xf32>
    %79 = vector.multi_reduction <add>, %78, %cst_30 [0] : vector<8x1xf32> to vector<1xf32>
    %80 = vector.shape_cast %79 : vector<1xf32> to vector<1x1xf32>
    %cst_31 = arith.constant 8.000000e+00 : f32
    %81 = vector.broadcast %cst_31 : f32 to vector<1x1xf32>
    %82 = arith.divf %80, %81 : vector<1x1xf32>
    %83 = vector.extract_strided_slice %13 {offsets = [8, 0], sizes = [8, 32], strides = [1, 1]} : vector<16x32xf32> to vector<8x32xf32>
    %cst_32 = arith.constant dense<0.000000e+00> : vector<32xf32>
    %84 = vector.multi_reduction <add>, %83, %cst_32 [0] : vector<8x32xf32> to vector<32xf32>
    %85 = vector.shape_cast %84 : vector<32xf32> to vector<1x32xf32>
    %cst_33 = arith.constant 8.000000e+00 : f32
    %86 = vector.broadcast %cst_33 : f32 to vector<1x32xf32>
    %87 = arith.divf %85, %86 : vector<1x32xf32>
    %88 = arith.mulf %83, %83 : vector<8x32xf32>
    %cst_34 = arith.constant dense<0.000000e+00> : vector<32xf32>
    %89 = vector.multi_reduction <add>, %88, %cst_34 [0] : vector<8x32xf32> to vector<32xf32>
    %90 = vector.shape_cast %89 : vector<32xf32> to vector<1x32xf32>
    %cst_35 = arith.constant 8.000000e+00 : f32
    %91 = vector.broadcast %cst_35 : f32 to vector<1x32xf32>
    %92 = arith.divf %90, %91 : vector<1x32xf32>
    %93 = arith.mulf %87, %87 : vector<1x32xf32>
    %94 = arith.subf %92, %93 : vector<1x32xf32>
    %95 = vector.broadcast %87 : vector<1x32xf32> to vector<8x32xf32>
    %96 = arith.subf %83, %95 : vector<8x32xf32>
    %cst_36 = arith.constant 9.99999974E-6 : f32
    %97 = vector.broadcast %cst_36 : f32 to vector<1x32xf32>
    %98 = arith.addf %94, %97 : vector<1x32xf32>
    %99 = math.rsqrt %98 : vector<1x32xf32>
    %100 = arith.mulf %99, %1 : vector<1x32xf32>
    %101 = vector.broadcast %100 : vector<1x32xf32> to vector<8x32xf32>
    %102 = arith.mulf %96, %101 : vector<8x32xf32>
    %103 = vector.broadcast %2 : vector<1x32xf32> to vector<8x32xf32>
    %104 = arith.addf %102, %103 : vector<8x32xf32>
    %cst_37 = arith.constant 0.000000e+00 : f32
    %105 = vector.broadcast %cst_37 : f32 to vector<8x32xf32>
    %106 = arith.maximumf %104, %105 : vector<8x32xf32>
    %107 = vector.broadcast %3 : vector<1x32xf32> to vector<8x32xf32>
    %108 = arith.mulf %106, %107 : vector<8x32xf32>
    %cst_38 = arith.constant dense<0.000000e+00> : vector<8xf32>
    %109 = vector.multi_reduction <add>, %108, %cst_38 [1] : vector<8x32xf32> to vector<8xf32>
    %110 = vector.shape_cast %109 : vector<8xf32> to vector<8x1xf32>
    %111 = vector.broadcast %4 : vector<1x1xf32> to vector<8x1xf32>
    %112 = arith.addf %110, %111 : vector<8x1xf32>
    %cst_39 = arith.constant dense<0.000000e+00> : vector<1xf32>
    %113 = vector.multi_reduction <add>, %112, %cst_39 [0] : vector<8x1xf32> to vector<1xf32>
    %114 = vector.shape_cast %113 : vector<1xf32> to vector<1x1xf32>
    %cst_40 = arith.constant 8.000000e+00 : f32
    %115 = vector.broadcast %cst_40 : f32 to vector<1x1xf32>
    %116 = arith.divf %114, %115 : vector<1x1xf32>
    %117 = arith.mulf %112, %112 : vector<8x1xf32>
    %cst_41 = arith.constant dense<0.000000e+00> : vector<1xf32>
    %118 = vector.multi_reduction <add>, %117, %cst_41 [0] : vector<8x1xf32> to vector<1xf32>
    %119 = vector.shape_cast %118 : vector<1xf32> to vector<1x1xf32>
    %cst_42 = arith.constant 8.000000e+00 : f32
    %120 = vector.broadcast %cst_42 : f32 to vector<1x1xf32>
    %121 = arith.divf %119, %120 : vector<1x1xf32>
    %122 = arith.mulf %116, %116 : vector<1x1xf32>
    %123 = arith.subf %121, %122 : vector<1x1xf32>
    %124 = vector.broadcast %116 : vector<1x1xf32> to vector<8x1xf32>
    %125 = arith.subf %112, %124 : vector<8x1xf32>
    %cst_43 = arith.constant 9.99999974E-6 : f32
    %126 = vector.broadcast %cst_43 : f32 to vector<1x1xf32>
    %127 = arith.addf %123, %126 : vector<1x1xf32>
    %128 = math.rsqrt %127 : vector<1x1xf32>
    %129 = arith.mulf %128, %5 : vector<1x1xf32>
    %130 = vector.broadcast %129 : vector<1x1xf32> to vector<8x1xf32>
    %131 = arith.mulf %125, %130 : vector<8x1xf32>
    %132 = vector.broadcast %6 : vector<1x1xf32> to vector<8x1xf32>
    %133 = arith.addf %131, %132 : vector<8x1xf32>
    %cst_44 = arith.constant 0.000000e+00 : f32
    %134 = vector.broadcast %cst_44 : f32 to vector<8x1xf32>
    %135 = arith.maximumf %133, %134 : vector<8x1xf32>
    %136 = math.absf %133 : vector<8x1xf32>
    %cst_45 = arith.constant 0.000000e+00 : f32
    %137 = vector.broadcast %cst_45 : f32 to vector<8x1xf32>
    %138 = arith.subf %137, %136 : vector<8x1xf32>
    %139 = math.exp %138 : vector<8x1xf32>
    %cst_46 = arith.constant 1.000000e+00 : f32
    %140 = vector.broadcast %cst_46 : f32 to vector<8x1xf32>
    %141 = arith.addf %140, %139 : vector<8x1xf32>
    %142 = math.log %141 : vector<8x1xf32>
    %143 = arith.addf %135, %142 : vector<8x1xf32>
    %cst_47 = arith.constant 1.000000e+02 : f32
    %144 = vector.broadcast %cst_47 : f32 to vector<8x1xf32>
    %145 = arith.minimumf %143, %144 : vector<8x1xf32>
    %cst_48 = arith.constant dense<0.000000e+00> : vector<1xf32>
    %146 = vector.multi_reduction <add>, %145, %cst_48 [0] : vector<8x1xf32> to vector<1xf32>
    %147 = vector.shape_cast %146 : vector<1xf32> to vector<1x1xf32>
    %cst_49 = arith.constant 8.000000e+00 : f32
    %148 = vector.broadcast %cst_49 : f32 to vector<1x1xf32>
    %149 = arith.divf %147, %148 : vector<1x1xf32>
    %150 = arith.addf %82, %149 : vector<1x1xf32>
    %c0_50 = arith.constant 0 : index
    %c0_51 = arith.constant 0 : index
    %151 = vector.load %arg4[%c0_50, %c0_51] : memref<1x1xf32, #tpu.memory_space<vmem>>, vector<1x1xf32>
    tpu.vector_store %arg4[%c0_50, %c0_51], %150 {strides = array<i32>} : memref<1x1xf32, #tpu.memory_space<vmem>>, vector<1x1xf32>,
    return
  }
}

</mosaic_0001>

<bundles_post_ra>
// kernel: tpu_custom_call.1
= control target key start
LH: loop header
LB: loop body
LE: loop exit
PB: predicated region body
PF: predicated region fallthrough
CT: control target
= control target key end

     0   :  { %s585_s0 = inlined_call_operand.vmem [shape: f32[8,128], index: 0, kind: input, shape index: {}]   ;;  %s586_s1 = inlined_call_operand.vmem [shape: f32[8,128], index: 1, kind: input, shape index: {}]   ;;  %s587_s2 = inlined_call_operand.vmem [shape: f32[128,32], index: 2, kind: input, shape index: {}]   ;;  %s588_s3 = inlined_call_operand.vmem [shape: f32[8,32], index: 3, kind: input, shape index: {}]   ;;  %s589_s4 = inlined_call_operand.hbm [shape: f32[1,1], index: 4, kind: output, shape index: {}]  }
   0x1   :  { %v27_v0 = vld [vmem:[%s587_s2] sm:$0xff]  ;;  %v28_v1 = vld [vmem:[%s587_s2 + $0x8] sm:$0xff]  ;;  %v29_v2 = vld [vmem:[%s587_s2 + $0x10] sm:$0xff] }
   0x2   :  { %v381_v3 = vpack.c.bf16 %v28_v1, %v27_v0  ;;  %v30_v4 = vld [vmem:[%s587_s2 + $0x18] sm:$0xff]  ;;  %v31_v6 = vld [vmem:[%s587_s2 + $0x20] sm:$0xff]  ;;  %v32_v7 = vld [vmem:[%s587_s2 + $0x28] sm:$0xff] }
   0x3   :  { %v385_v5 = vpack.c.bf16 %v30_v4, %v29_v2  ;;  %v389_v8 = vpack.c.bf16 %v32_v7, %v31_v6  ;;  %v25_v9 = vld [vmem:[%s585_s0] sm:$0xff]  ;;  %v33_v10 = vld [vmem:[%s587_s2 + $0x30] sm:$0xff]  ;;  %v34_v11 = vld [vmem:[%s587_s2 + $0x38] sm:$0xff] }
   0x4   :  { %382 = vmatprep.subr.bf16.mxu0 %v381_v3  ;;  %378 = vmatprep.mubr.f32.mxu0 %v25_v9 }
   0x5   :  { %384 = vmatpush3.bf16.msra.mxu0 %v381_v3 }
   0x6   :  { %386 = vmatprep.subr.bf16.mxu0 %v385_v5 }
   0x7   :  { %9 = vsyncpa [#allocation3], 0  ;;  %v393_v12 = vpack.c.bf16 %v34_v11, %v33_v10  ;;  %v35_v13 = vld [vmem:[%s587_s2 + $0x40] sm:$0xff]  ;;  %v36_v14 = vld [vmem:[%s587_s2 + $0x48] sm:$0xff]  ;;  %vm122_vm0 = vcmask 261120   ;;  %v147_v7 = vlaneseq  ;;  %vm171_vm1 = vcmask 7168  }
   0x8   :  { %v397_v15 = vpack.c.bf16 %v36_v14, %v35_v13  ;;  %v37_v16 = vld [vmem:[%s587_s2 + $0x50] sm:$0xff]  ;;  %v38_v17 = vld [vmem:[%s587_s2 + $0x58] sm:$0xff]  ;;  %v39_v19 = vld [vmem:[%s587_s2 + $0x60] sm:$0xff]  ;;  %vm307_vm2 = vcmask 0  }
   0x9   :  { %388 = vmatpush3.bf16.msra.mxu0 %v385_v5  ;;  %v401_v18 = vpack.c.bf16 %v38_v17, %v37_v16  ;;  %v40_v20 = vld [vmem:[%s587_s2 + $0x68] sm:$0xff]  ;;  %v41_v22 = vld [vmem:[%s587_s2 + $0x70] sm:$0xff]  ;;  %v42_v23 = vld [vmem:[%s587_s2 + $0x78] sm:$0xff] }
   0xa   :  { %390 = vmatprep.subr.bf16.mxu0 %v389_v8  ;;  %v405_v21 = vpack.c.bf16 %v40_v20, %v39_v19  ;;  %v409_v24 = vpack.c.bf16 %v42_v23, %v41_v22  ;;  %v26_v25 = vld [vmem:[%s586_s1] sm:$0xff] }
   0xb   :  { %v323_v26 = vld [vmem:[%s588_s3] ss:$0 sm:$0xff]  ;;  %v19_v9 = vld [vmem:[%s588_s3 + $0x1] sm:$0x1] }
   0xd   :  { %392 = vmatpush3.bf16.msra.mxu0 %v389_v8  ;;  %v148_v8 = vshrl.u32 %v147_v7, 7 }
   0xe   :  { %394 = vmatprep.subr.bf16.mxu0 %v393_v12 }
   0xf   :  { %v544_v10 = vsub.s32 0, %v148_v8 }
  0x11   :  { %396 = vmatpush3.bf16.msra.mxu0 %v393_v12 }
  0x12   :  { %398 = vmatprep.subr.bf16.mxu0 %v397_v15 }
  0x15   :  { %400 = vmatpush3.bf16.msra.mxu0 %v397_v15 }
  0x16   :  { %402 = vmatprep.subr.bf16.mxu0 %v401_v18 }
  0x19   :  { %404 = vmatpush3.bf16.msra.mxu0 %v401_v18  ;;  %v324_v18 = vld [vmem:[%s588_s3 + $0x2] ss:$0 sm:$0xff] }
  0x1a   :  { %406 = vmatprep.subr.bf16.mxu0 %v405_v21 }
  0x1d   :  { %408 = vmatpush3.bf16.msra.mxu0 %v405_v21 }
  0x1e   :  { %410 = vmatprep.subr.bf16.mxu0 %v409_v24 }
  0x21   :  { %412 = vmatpush3.bf16.msra.mxu0 %v409_v24  ;;  %v325_v24 = vld [vmem:[%s588_s3 + $0x3] ss:$0 sm:$0xff] }
  0x24   :  { %379 = vmatmul.mubr.f32.vlgmr.msra.gmra.mrb[0].mxu0 %v26_v25 }
  0xf7   :  { %v380_v27 = vpop.f32.mrb[0].mxu0 }
  0xf8   :  { %v119_v28 = vadd.f32 %v380_v27, %v323_v26  ;;  %v113_v29 = vpop.f32.mrb[1].mxu0 }
  0xf9   :  { %v114_v30 = vadd.f32 %v323_v26, %v113_v29 }
  0xfa   :  { %v224_v31 = vsel %vm122_vm0, %v119_v28, 0.0  ;;  %v232_v32 = vmul.f32 %v119_v28, %v119_v28 }
  0xfb   :  { %v225_v33 = vrot.slane %v224_v31, 4  ;;  %v123_v34 = vsel %vm122_vm0, %v114_v30, 0.0  ;;  %v132_v35 = vmul.f32 %v114_v30, %v114_v30 }
  0xfc   :  { %v233_v36 = vsel %vm122_vm0, %v232_v32, 0.0  ;;  %v124_v37 = vrot.slane %v123_v34, 4 }
  0xfd   :  { %v226_v38 = vadd.f32 %v225_v33, %v224_v31  ;;  %v234_v39 = vrot.slane %v233_v36, 4  ;;  %v133_v40 = vsel %vm122_vm0, %v132_v35, 0.0  ;;  %v326_v31 = vld [vmem:[%s588_s3 + $0x4] ss:$0 sm:$0xff] }
  0xfe   :  { %v125_v41 = vadd.f32 %v124_v37, %v123_v34  ;;  %v134_v42 = vrot.slane %v133_v40, 4 }
  0xff   :  { %v227_v43 = vrot.slane %v226_v38, 2  ;;  %v235_v44 = vadd.f32 %v234_v39, %v233_v36 }
 0x100   :  { %v126_v45 = vrot.slane %v125_v41, 2  ;;  %v135_v46 = vadd.f32 %v134_v42, %v133_v40 }
 0x101   :  { %v228_v47 = vadd.f32 %v227_v43, %v226_v38  ;;  %v236_v48 = vrot.slane %v235_v44, 2 }
 0x102   :  { %v127_v49 = vadd.f32 %v126_v45, %v125_v41  ;;  %v136_v50 = vrot.slane %v135_v46, 2 }
 0x103   :  { %v229_v51 = vrot.slane %v228_v47, 1  ;;  %v237_v52 = vadd.f32 %v236_v48, %v235_v44 }
 0x104   :  { %v128_v53 = vrot.slane %v127_v49, 1  ;;  %v137_v54 = vadd.f32 %v136_v50, %v135_v46 }
 0x105   :  { %v230_v55 = vadd.f32 %v229_v51, %v228_v47  ;;  %v238_v56 = vrot.slane %v237_v52, 1 }
 0x106   :  { %v129_v57 = vadd.f32 %v128_v53, %v127_v49  ;;  %v138_v58 = vrot.slane %v137_v54, 1 }
 0x107   :  { %v231_v59 = vmul.f32 0.125, %v230_v55  ;;  %v239_v60 = vadd.f32 %v238_v56, %v237_v52 }
 0x108   :  { %v131_v61 = vmul.f32 0.125, %v129_v57  ;;  %v139_v62 = vadd.f32 %v138_v58, %v137_v54 }
 0x109   :  { %v240_v63 = vmul.f32 0.125, %v239_v60  ;;  %v241_v0 = vmul.f32 %v231_v59, %v231_v59  ;;  %v243_v15 = vsub.f32 %v119_v28, %v231_v59 }
 0x10a   :  { %v140_v1 = vmul.f32 0.125, %v139_v62  ;;  %v141_v2 = vmul.f32 %v131_v61, %v131_v61  ;;  %v143_v17 = vsub.f32 %v114_v30, %v131_v61 }
 0x10b   :  { %v242_v3 = vsub.f32 %v240_v63, %v241_v0 }
 0x10c   :  { %v142_v4 = vsub.f32 %v140_v1, %v141_v2 }
 0x10d   :  { %v244_v5 = vadd.f32 1e-05, %v242_v3 }
 0x10e   :  { %v144_v6 = vadd.f32 1e-05, %v142_v4 }
 0x10f   :  { %414 = vrsqrt.f32 %v244_v5 }
 0x110   :  { %416 = vrsqrt.f32 %v144_v6 }
 0x119   :  { %v415_v11 = vpop.eup %414 }
 0x11a   :  { %v417_v12 = vpop.eup %416  ;;  %v246_v13 = vmul.f32 %v415_v11, %v19_v9 }
 0x11b   :  { %v146_v14 = vmul.f32 %v417_v12, %v19_v9 }
 0x11c   :  { %v250_v16 = vrot.slane %v246_v13, %v544_v10  ;;  %v23_v13 = vld [vmem:[%s588_s3 + $0x5] sm:$0x1] }
 0x11d   :  { %v150_v19 = vrot.slane %v146_v14, %v544_v10 }
 0x11e   :  { %v251_v20 = vmul.f32 %v250_v16, %v243_v15 }
 0x11f   :  { %v151_v21 = vmul.f32 %v150_v19, %v143_v17 }
 0x120   :  { %v252_v22 = vadd.f32 %v324_v18, %v251_v20 }
 0x121   :  { %v156_v23 = vadd.f32 %v324_v18, %v151_v21  ;;  %v327_v18 = vld [vmem:[%s588_s3 + $0x6] ss:$0 sm:$0xff]  ;;  %s454_s3 = smov [#allocation2]  }
 0x122   :  { %v253_v26 = vmax.f32 %v252_v22, 0.0  ;;  %s315_s10 = sshll.u32 %s454_s3, 4  ;;  %s316_s10 = int_to_ptr.vmem [resolvable:$true] %s315_s10 }
 0x123   :  { %v157_v25 = vmax.f32 %v156_v23, 0.0  ;;  %s430_s0 = scalar_lea.vmem %s316_s10, 16  ;;  %s434_s11 = scalar_lea.vmem %s316_s10, 32 }
 0x124   :  { %v254_v29 = vmul.f32 %v325_v24, %v253_v26  ;;  %p431_p0 = scmp.ne.s32.totalorder %s316_s10, %s430_s0  ;;  %p435_p1 = scmp.lt.s32.totalorder %s316_s10, %s316_s10 }
 0x125   :  { %v162_v27 = vmul.f32 %v325_v24, %v157_v25  ;;  %p436_p2 = scmp.lt.s32.totalorder %s434_s11, %s430_s0 }
 0x126   :  { %v255_v30 = vsel %vm122_vm0, %v254_v29, 0.0 }
 0x127   :  { %v163_v28 = vsel %vm122_vm0, %v162_v27, 0.0  ;;  %p437_p3 = por %p436_p2, %p435_p1 }
 0x128   :  { %164 = vadd.xlane.f32.xlu0 %v163_v28 }
 0x129   :  { %p438_p4 = pnand %p437_p3, %p431_p0 }
 0x12c   :  { %256 = vadd.xlane.f32.xlu0 %v255_v30 }
 0x1b5   :  { %v165_v32 = vpop.xlane.xlu0 %164 }
 0x1b6   :  { %v170_v33 = vadd.f32 %v326_v31, %v165_v32 }
 0x1b8   :  { %v172_v34 = vsel %vm171_vm1, %v170_v33, 0.0  ;;  %v180_v35 = vmul.f32 %v170_v33, %v170_v33 }
 0x1b9   :  { %v173_v36 = vrot.slane %v172_v34, 4  ;;  %v257_v37 = vpop.xlane.xlu0 %256 }
 0x1ba   :  { %v181_v38 = vsel %vm171_vm1, %v180_v35, 0.0  ;;  %v258_v39 = vadd.f32 %v326_v31, %v257_v37 }
 0x1bb   :  { %v174_v40 = vadd.f32 %v173_v36, %v172_v34  ;;  %v182_v41 = vrot.slane %v181_v38, 4 }
 0x1bc   :  { %v259_v42 = vsel %vm171_vm1, %v258_v39, 0.0  ;;  %v267_v43 = vmul.f32 %v258_v39, %v258_v39 }
 0x1bd   :  { %v175_v44 = vrot.slane %v174_v40, 2  ;;  %v183_v45 = vadd.f32 %v182_v41, %v181_v38  ;;  %v260_v46 = vrot.slane %v259_v42, 4 }
 0x1be   :  { %v268_v47 = vsel %vm171_vm1, %v267_v43, 0.0 }
 0x1bf   :  { %v176_v48 = vadd.f32 %v175_v44, %v174_v40  ;;  %v184_v49 = vrot.slane %v183_v45, 2  ;;  %v261_v50 = vadd.f32 %v260_v46, %v259_v42  ;;  %v269_v51 = vrot.slane %v268_v47, 4 }
 0x1c1   :  { %v177_v52 = vrot.slane %v176_v48, 1  ;;  %v185_v53 = vadd.f32 %v184_v49, %v183_v45  ;;  %v262_v54 = vrot.slane %v261_v50, 2  ;;  %v270_v55 = vadd.f32 %v269_v51, %v268_v47 }
 0x1c3   :  { %v178_v56 = vadd.f32 %v177_v52, %v176_v48  ;;  %v186_v57 = vrot.slane %v185_v53, 1  ;;  %v263_v58 = vadd.f32 %v262_v54, %v261_v50  ;;  %v271_v59 = vrot.slane %v270_v55, 2 }
 0x1c5   :  { %v179_v60 = vmul.f32 0.125, %v178_v56  ;;  %v187_v61 = vadd.f32 %v186_v57, %v185_v53  ;;  %v264_v62 = vrot.slane %v263_v58, 1  ;;  %v272_v63 = vadd.f32 %v271_v59, %v270_v55 }
 0x1c7   :  { %v188_v0 = vmul.f32 0.125, %v187_v61  ;;  %v189_v1 = vmul.f32 %v179_v60, %v179_v60  ;;  %v265_v2 = vadd.f32 %v264_v62, %v263_v58  ;;  %v273_v3 = vrot.slane %v272_v63, 1 }
 0x1c8   :  { %v191_v16 = vsub.f32 %v170_v33, %v179_v60 }
 0x1c9   :  { %v190_v4 = vsub.f32 %v188_v0, %v189_v1  ;;  %v266_v5 = vmul.f32 0.125, %v265_v2  ;;  %v274_v6 = vadd.f32 %v273_v3, %v272_v63 }
 0x1cb   :  { %v192_v7 = vadd.f32 1e-05, %v190_v4  ;;  %v276_v8 = vmul.f32 %v266_v5, %v266_v5  ;;  %v275_v9 = vmul.f32 0.125, %v274_v6  ;;  %v278_v23 = vsub.f32 %v258_v39, %v266_v5 }
 0x1cd   :  { %418 = vrsqrt.f32 %v192_v7  ;;  %v277_v11 = vsub.f32 %v275_v9, %v276_v8 }
 0x1cf   :  { %v279_v12 = vadd.f32 1e-05, %v277_v11 }
 0x1d1   :  { %420 = vrsqrt.f32 %v279_v12 }
 0x1d7   :  { %v419_v14 = vpop.eup %418 }
 0x1d8   :  { %v194_v15 = vmul.f32 %v419_v14, %v23_v13 }
 0x1da   :  { %v198_v17 = vrot.slane %v194_v15, %v544_v10 }
 0x1db   :  { %v421_v19 = vpop.eup %420 }
 0x1dc   :  { %v199_v20 = vmul.f32 %v198_v17, %v191_v16  ;;  %v281_v21 = vmul.f32 %v421_v19, %v23_v13 }
 0x1de   :  { %v204_v22 = vadd.f32 %v327_v18, %v199_v20  ;;  %v285_v24 = vrot.slane %v281_v21, %v544_v10 }
 0x1e0   :  { %v205_v25 = vsub.f32 0.0, %v204_v22  ;;  %v286_v26 = vmul.f32 %v285_v24, %v278_v23 }
 0x1e2   :  { %v207_v27 = vand.u32 2147483647, %v205_v25  ;;  %v287_v28 = vadd.f32 %v327_v18, %v286_v26  ;;  %v206_v39 = vmax.f32 %v205_v25, 0.0 }
 0x1e4   :  { %v208_v29 = vsub.f32 0.0, %v207_v27  ;;  %v289_v30 = vand.u32 2147483647, %v287_v28  ;;  %v288_v42 = vmax.f32 %v287_v28, 0.0 }
 0x1e6   :  { %v209_v31 = vmul.f32 1.442695, %v208_v29  ;;  %v290_v32 = vsub.f32 0.0, %v289_v30 }
 0x1e8   :  { %422 = vpow2.f32 %v209_v31  ;;  %v291_v33 = vmul.f32 1.442695, %v290_v32 }
 0x1ea   :  { %424 = vpow2.f32 %v291_v33 }
 0x1f2   :  { %v423_v34 = vpop.eup %422 }
 0x1f3   :  { %v211_v35 = vadd.f32 1.0, %v423_v34 }
 0x1f4   :  { %v425_v36 = vpop.eup %424 }
 0x1f5   :  { %426 = vlog2.f32 %v211_v35  ;;  %v293_v37 = vadd.f32 1.0, %v425_v36 }
 0x1f7   :  { %428 = vlog2.f32 %v293_v37 }
 0x1ff   :  { %v427_v38 = vpop.eup %426 }
 0x200   :  { %v213_v10 = vmul.f32 0.6931472, %v427_v38 }
 0x201   :  { %v429_v40 = vpop.eup %428 }
 0x202   :  { %v214_v41 = vadd.f32 %v213_v10, %v206_v39  ;;  %v295_v43 = vmul.f32 0.6931472, %v429_v40 }
 0x204   :  { %v215_v44 = vmin.f32 %v214_v41, 100.0  ;;  %v296_v45 = vadd.f32 %v295_v43, %v288_v42 }
 0x206   :  { %v216_v46 = vsel %vm171_vm1, %v215_v44, 0.0  ;;  %v297_v48 = vmin.f32 %v296_v45, 100.0 }
 0x207   :  { %v217_v47 = vrot.slane %v216_v46, 4 }
 0x208   :  { %v298_v50 = vsel %vm171_vm1, %v297_v48, 0.0 }
 0x209   :  { %v218_v49 = vadd.f32 %v217_v47, %v216_v46  ;;  %v299_v51 = vrot.slane %v298_v50, 4 }
 0x20b   :  { %v219_v52 = vrot.slane %v218_v49, 2  ;;  %v300_v53 = vadd.f32 %v299_v51, %v298_v50 }
 0x20d   :  { %v220_v54 = vadd.f32 %v219_v52, %v218_v49  ;;  %v301_v55 = vrot.slane %v300_v53, 2 }
 0x20f   :  { %v221_v56 = vrot.slane %v220_v54, 1  ;;  %v302_v57 = vadd.f32 %v301_v55, %v300_v53 }
 0x211   :  { %v222_v58 = vadd.f32 %v221_v56, %v220_v54  ;;  %v303_v59 = vrot.slane %v302_v57, 1 }
 0x213   :  { %v304_v60 = vadd.f32 %v303_v59, %v302_v57  ;;  %v223_v61 = vmul.f32 0.125, %v222_v58 }
 0x215   :  { %v305_v62 = vmul.f32 0.125, %v304_v60 }
 0x217   :  { %v306_v63 = vadd.f32 %v305_v62, %v223_v61 }
 0x219   :  { %308 = vst.msk [vmem:[#allocation2] sm:$0x1] %vm307_vm2, %v306_v63 }
 0x21a   :  { %441 = shalt.err (!%p438_p4)
}
 0x21b   :  { %s442_s14 = scalar_lea.hbm %s589_s4, 16 }
 0x21c   :  { %p443_p5 = scmp.ne.s32.totalorder %s589_s4, %s442_s14  ;;  %p446_p6 = scmp.lt.u32.totalorder %s442_s14, %s589_s4 }
 0x21e   :  { %p448_p7 = pnand %p446_p6, %p443_p5 }
 0x220   :  { %451 = shalt.err (!%p448_p7)
}
 0x221   :  { %318 = dma.vmem_to_hbm [thread:$0]  %s316_s10, 16, %s589_s4, [#allocation3]  }
 0x222   :  { %452 = dma.done.wait [#allocation3], 16  }
 0x223   :  { %453 = vsyncadd [#allocation3], 4294967280 }
 0x224   :  { %322 = vsyncpa [#allocation3], 1 }

</bundles_post_ra>
